<compile_context>
chip_gen: v6e
topology: v6e:2x2x1
jax: 0.10.0
libtpu: 0.0.40
codegen_flags: <defaults>
</compile_context>

<pallas_src>
import jax
import jax.numpy as jnp
from jax.experimental import pallas as pl
from jax.experimental.pallas import tpu as pltpu


def _noise_clamp_kernel(x_ref, noise_ref, o_ref):
    # x_ref / o_ref: (TR, TL) lane-dense tile.
    # noise_ref:     (1, TL)  resident row; broadcasts over the sublane axis.
    x = x_ref[...].astype(jnp.float32)
    n = noise_ref[...].astype(jnp.float32)
    o_ref[...] = jnp.clip(x - n, 0.0, 1.0).astype(o_ref.dtype)


def dynamic_gnoise(x, noise, *, training=True):
    """x: (N, C, H, W); noise: (H, W). Returns clamp(x - noise, 0, 1)."""
    if not training:
        return x
    N, C, H, W = x.shape
    assert noise.shape == (H, W)
    R, HW = N * C, H * W
    itemsize = jnp.dtype(x.dtype).itemsize

    # Free (contiguous) reshapes: row = (n, c), lane = (h, w).
    x2 = x.reshape(R, HW)
    noise2 = noise.reshape(1, HW)

    # --- Lane tile ----------------------------------------------------------
    # Use the full H*W extent when modest (always a legal block shape).  For
    # very large images pick the largest 128-aligned chunk <= 64 KiB/row that
    # divides H*W (no masked edge blocks), falling back to 16384.
    MAX_LANE = 16384
    if HW <= MAX_LANE or HW % 128 != 0:
        tl = HW
    else:
        tl = MAX_LANE
        for cand in range(MAX_LANE, 127, -128):
            if HW % cand == 0:
                tl = cand
                break

    # --- Row tile -----------------------------------------------------------
    # Aim for ~2 MiB input blocks; row count must be a multiple of 8 or the
    # full row extent.  Double-buffered (in + out) footprint ~= 8 MiB, within
    # the default scoped-VMEM limit on all of v5e / v6e / v7x.
    target_bytes = 2 << 20
    rows_budget = max(1, target_bytes // max(tl * itemsize, 1))
    if R <= max(rows_budget, 8):
        tr = R  # full-extent row block
    else:
        tr = max(8, (rows_budget // 8) * 8)

    grid = (pl.cdiv(R, tr), pl.cdiv(HW, tl))

    out2 = pl.pallas_call(
        _noise_clamp_kernel,
        out_shape=jax.ShapeDtypeStruct((R, HW), x.dtype),
        grid=grid,
        in_specs=[
            pl.BlockSpec((tr, tl), lambda i, j: (i, j)),
            # Noise: constant block index along rows -> stays resident; tiled
            # only along the lane axis.
            pl.BlockSpec((1, tl), lambda i, j: (0, j)),
        ],
        out_specs=pl.BlockSpec((tr, tl), lambda i, j: (i, j)),
        compiler_params=pltpu.CompilerParams(
            # Both axes independent -> megacore sharding on v7x's 2 TCs.
            dimension_semantics=("parallel", "parallel")),
    )(x2, noise2)

    return out2.reshape(N, C, H, W)


if __name__ == "__main__":
    N, C, H, W = 2, 4, 16, 16
    std = 0.05

    key = jax.random.PRNGKey(0)
    kx, kn = jax.random.split(key)
    # Input activations (e.g. post-sigmoid-ish values in [0, 1]).
    x = jax.random.uniform(kx, (N, C, H, W), dtype=jnp.float32)
    # Fresh noise per forward call (functional equivalent of
    # self.noise.data.normal_(0, std)); thread a new key each call under jit.
    noise = std * jax.random.normal(kn, (H, W), dtype=jnp.float32)

    out = dynamic_gnoise(x, noise, training=True)
    out = jax.block_until_ready(out)

    # Reference check (pure JAX).
    ref = jnp.clip(x - noise[None, None, :, :], 0.0, 1.0)
    assert out.shape == x.shape and out.dtype == x.dtype
    assert jnp.max(jnp.abs(out - ref)) < 1e-6

    # bf16 input path: compute in f32 inside the kernel, cast at the store.
    x_bf16 = x.astype(jnp.bfloat16)
    out_bf16 = jax.block_until_ready(dynamic_gnoise(x_bf16, noise, training=True))
    ref_bf16 = jnp.clip(x_bf16.astype(jnp.float32) - noise[None, None], 0.0, 1.0
                        ).astype(jnp.bfloat16)
    assert out_bf16.dtype == jnp.bfloat16
    assert jnp.max(jnp.abs(out_bf16.astype(jnp.float32)
                           - ref_bf16.astype(jnp.float32))) < 1e-2

    # training=False path: identity.
    out_eval = dynamic_gnoise(x, noise, training=False)
    assert jnp.array_equal(out_eval, x)

    print("KERNEL_OK")
</pallas_src>

<mosaic_0001>
module attributes {stable_mosaic.version = 11 : i64} {
  func.func @_noise_clamp_kernel(%arg0: i32, %arg1: i32, %arg2: memref<8x256xf32, #tpu.memory_space<vmem>>, %arg3: memref<1x256xf32, #tpu.memory_space<vmem>>, %arg4: memref<8x256xf32, #tpu.memory_space<vmem>>) attributes {dimension_semantics = [#tpu.dimension_semantics<parallel>, #tpu.dimension_semantics<parallel>], iteration_bounds = array<i64: 1, 1>, scalar_prefetch = 0 : i64, scratch_operands = 0 : i64, tpu.core_type = #tpu.core_type<tc>, window_params = [{transform_indices = @transform_0, window_bounds = array<i64: 8, 256>}, {transform_indices = @transform_1, window_bounds = array<i64: 1, 256>}, {transform_indices = @transform_2, window_bounds = array<i64: 8, 256>}]} {
    %c0 = arith.constant 0 : index
    %c0_0 = arith.constant 0 : index
    %0 = vector.load %arg2[%c0, %c0_0] : memref<8x256xf32, #tpu.memory_space<vmem>>, vector<8x256xf32>
    %c0_1 = arith.constant 0 : index
    %c0_2 = arith.constant 0 : index
    %1 = vector.load %arg3[%c0_1, %c0_2] : memref<1x256xf32, #tpu.memory_space<vmem>>, vector<1x256xf32>
    %2 = vector.broadcast %1 : vector<1x256xf32> to vector<8x256xf32>
    %3 = arith.subf %0, %2 : vector<8x256xf32>
    %cst = arith.constant 0.000000e+00 : f32
    %cst_3 = arith.constant 1.000000e+00 : f32
    %4 = vector.broadcast %cst : f32 to vector<8x256xf32>
    %5 = arith.maximumf %4, %3 : vector<8x256xf32>
    %6 = vector.broadcast %cst_3 : f32 to vector<8x256xf32>
    %7 = arith.minimumf %6, %5 : vector<8x256xf32>
    %c0_4 = arith.constant 0 : index
    %c0_5 = arith.constant 0 : index
    %8 = vector.load %arg4[%c0_4, %c0_5] : memref<8x256xf32, #tpu.memory_space<vmem>>, vector<8x256xf32>
    tpu.vector_store %arg4[%c0_4, %c0_5], %7 {strides = array<i32>} : memref<8x256xf32, #tpu.memory_space<vmem>>, vector<8x256xf32>,
    return
  }
  func.func @transform_0(%arg0: i32, %arg1: i32) -> (i32, i32) {
    %c0_i32 = arith.constant 0 : i32
    return %arg0, %arg1 : i32, i32
  }
  func.func @transform_1(%arg0: i32, %arg1: i32) -> (i32, i32) {
    %c0_i32 = arith.constant 0 : i32
    %c0_i32_0 = arith.constant 0 : i32
    return %c0_i32, %arg1 : i32, i32
  }
  func.func @transform_2(%arg0: i32, %arg1: i32) -> (i32, i32) {
    %c0_i32 = arith.constant 0 : i32
    return %arg0, %arg1 : i32, i32
  }
}

</mosaic_0001>

<bundles_post_ra>
// kernel: tpu_custom_call.1
= control target key start
LH: loop header
LB: loop body
LE: loop exit
PB: predicated region body
PF: predicated region fallthrough
CT: control target
= control target key end

     0   :  { %7 = vsyncpa [#allocation3], 0  ;;  %s170_s0 = inlined_call_operand.hbm [shape: f32[8,256], index: 0, kind: input, shape index: {}]   ;;  %s171_s1 = inlined_call_operand.hbm [shape: f32[1,256], index: 1, kind: input, shape index: {}]   ;;  %s172_s2 = inlined_call_operand.hbm [shape: f32[8,256], index: 2, kind: output, shape index: {}]  }
   0x1   :  { %8 = vsyncpa [#allocation6], 0 }
   0x2   :  { %9 = vsyncpa [#allocation4], 0  ;;  %s143_s9 = smov [#allocation2]   ;;  %s144_s11 = smov [#allocation5]  }
   0x3   :  { %s16_s10 = sshll.u32 %s143_s9, 4  ;;  %s26_s12 = sshll.u32 %s144_s11, 4  ;;  %s17_s10 = int_to_ptr.vmem [resolvable:$true] %s16_s10  ;;  %s27_s12 = int_to_ptr.vmem [resolvable:$true] %s26_s12 }
   0x4   :  { %s85_s13 = scalar_lea.vmem %s17_s10, 256  ;;  %p90_p1 = scmp.lt.s32.totalorder %s17_s10, %s17_s10 }
   0x5   :  { %p86_p0 = scmp.ne.s32.totalorder %s17_s10, %s85_s13  ;;  %p91_p2 = scmp.lt.s32.totalorder %s85_s13, %s85_s13 }
   0x7   :  { %p92_p3 = por %p91_p2, %p90_p1 }
   0x9   :  { %p93_p4 = pnand %p92_p3, %p86_p0 }
   0xb   :  { %96 = shalt.err (!%p93_p4)
}
   0xc   :  { %19 = dma.hbm_to_vmem [thread:$0]  %s170_s0, 256, %s17_s10, [#allocation3]  }
   0xd   :  { %s105_s16 = scalar_lea.vmem %s27_s12, 32  ;;  %p110_p6 = scmp.lt.s32.totalorder %s27_s12, %s27_s12 }
   0xe   :  { %p106_p5 = scmp.ne.s32.totalorder %s27_s12, %s105_s16  ;;  %p111_p7 = scmp.lt.s32.totalorder %s105_s16, %s105_s16 }
  0x10   :  { %p112_p8 = por %p111_p7, %p110_p6 }
  0x12   :  { %p113_p9 = pnand %p112_p8, %p106_p5 }
  0x14   :  { %116 = shalt.err (!%p113_p9)
}
  0x15   :  { %29 = dma.hbm_to_vmem [thread:$0]  %s171_s1, 32, %s27_s12, [#allocation6]  }
  0x16   :  { %137 = dma.done.wait [#allocation3], 256  }
  0x17   :  { %138 = vsyncadd [#allocation3], 4294967040 }
  0x18   :  { %139 = dma.done.wait [#allocation6], 32  }
  0x19   :  { %140 = vsyncadd [#allocation6], 4294967264  ;;  %v40_v0 = vlaneseq  ;;  %v36_v4 = vld [vmem:[#allocation2] sm:$0xff]  ;;  %v38_v5 = vld [vmem:[#allocation5] sm:$0x3]  ;;  %s145_s0 = smov [#allocation7]  }
  0x1a   :  { %v37_v6 = vld [vmem:[#allocation2 + $0x8] sm:$0xff]  ;;  %s64_s19 = sshll.u32 %s145_s0, 4  ;;  %s65_s19 = int_to_ptr.vmem [resolvable:$true] %s64_s19 }
  0x1b   :  { %v41_v1 = vshrl.u32 %v40_v0, 7  ;;  %s117_s1 = scalar_lea.vmem %s65_s19, 256  ;;  %p122_p11 = scmp.lt.s32.totalorder %s65_s19, %s65_s19 }
  0x1c   :  { %p118_p10 = scmp.ne.s32.totalorder %s65_s19, %s117_s1  ;;  %p123_p12 = scmp.lt.s32.totalorder %s117_s1, %s117_s1 }
  0x1d   :  { %v42_v2 = vsub.s32 0, %v41_v1  ;;  %v46_v3 = vsub.s32 1, %v41_v1 }
  0x1e   :  { %p124_p13 = por %p123_p12, %p122_p11 }
  0x1f   :  { %v43_v7 = vrot.slane %v38_v5, %v42_v2  ;;  %v47_v8 = vrot.slane %v38_v5, %v46_v3 }
  0x20   :  { %p125_p0 = pnand %p124_p13, %p118_p10 }
  0x21   :  { %v50_v9 = vsub.f32 %v36_v4, %v43_v7  ;;  %v51_v10 = vsub.f32 %v37_v6, %v47_v8 }
  0x23   :  { %v52_v11 = vmax.f32 %v50_v9, 0.0  ;;  %v53_v12 = vmax.f32 %v51_v10, 0.0 }
  0x25   :  { %v54_v13 = vmin.f32 %v52_v11, 1.0  ;;  %v55_v14 = vmin.f32 %v53_v12, 1.0 }
  0x27   :  { %56 = vst [vmem:[#allocation7] sm:$0xff] %v54_v13  ;;  %57 = vst [vmem:[#allocation7 + $0x8] sm:$0xff] %v55_v14 }
  0x28   :  { %128 = shalt.err (!%p125_p0)
}
  0x29   :  { %67 = dma.vmem_to_hbm [thread:$0]  %s65_s19, 256, %s172_s2, [#allocation4]  }
  0x2a   :  { %141 = dma.done.wait [#allocation4], 256  }
  0x2b   :  { %142 = vsyncadd [#allocation4], 4294967040 }
  0x2c   :  { %71 = vsyncpa [#allocation3], 1 }
  0x2d   :  { %72 = vsyncpa [#allocation6], 1 }
  0x2e   :  { %73 = vsyncpa [#allocation4], 1 }

</bundles_post_ra>
